<compile_context>
chip_gen: v7x
topology: tpu7x:2x2x1
jax: 0.10.0
libtpu: 0.0.40
codegen_flags: <defaults>
</compile_context>

<pallas_src>
from functools import partial

import jax
import jax.numpy as jnp
from jax import lax
from jax.experimental import pallas as pl
from jax.experimental.pallas import tpu as pltpu

EPS = 1e-5  # nn.InstanceNorm1d default eps (affine=False, no running stats)


def _silat_kernel(x_ref, lt_ref, mrow_ref,
                  wq_ref, bq_ref, wk_ref, bk_ref,
                  wv_ref, bv_ref, wo_ref, bo_ref,
                  o_ref, *, num_heads):
    bb, HW, Cv = x_ref.shape
    n_l, Cl = lt_ref.shape[1], lt_ref.shape[2]
    Kc = wq_ref.shape[1]
    Vc = wv_ref.shape[1]
    Co = wo_ref.shape[1]
    H = num_heads
    dk, dv = Kc // H, Vc // H
    scale = Kc ** (-0.5)

    # ---- fused full-width projections (single MXU calls over the whole block) ----
    x2 = x_ref[...].reshape(bb * HW, Cv)          # layout-preserving (HW % 8 == 0)
    q2 = jnp.dot(x2, wq_ref[...], preferred_element_type=jnp.float32) + bq_ref[...]

    l2 = lt_ref[...].reshape(bb * n_l, Cl)
    k2 = jnp.dot(l2, wk_ref[...], preferred_element_type=jnp.float32) + bk_ref[...]
    v2 = jnp.dot(l2, wv_ref[...], preferred_element_type=jnp.float32) + bv_ref[...]

    # ---- f_query InstanceNorm1d over HW (per batch, per channel); fold the attention
    #      scale into the rsqrt factor so it costs nothing extra ----
    q3 = q2.reshape(bb, HW, Kc)
    qm = jnp.mean(q3, axis=1, keepdims=True)
    qv = jnp.mean(jnp.square(q3 - qm), axis=1, keepdims=True)
    qb = ((q3 - qm) * (lax.rsqrt(qv + EPS) * scale)).astype(jnp.bfloat16)  # cast once
    kb = k2.reshape(bb, n_l, Kc).astype(jnp.bfloat16)                      # cast once
    vb = v2.reshape(bb, n_l, Vc).astype(jnp.bfloat16)                      # cast once

    mrow = mrow_ref[...]                          # (bb, 1, n_l) f32
    add_mask = 10000.0 * mrow - 10000.0           # additive mask (makes k-mask redundant)

    # ---- attention: batch dim = bb, static loop over the (small) head count.
    #      (H is typically 1; per-head slicing is inherent to MHA, all heavy matmuls
    #       above/below are full width.) ----
    ctx_heads = []
    for h in range(H):
        qh = qb[:, :, h * dk:(h + 1) * dk]        # static lane slices
        kh = kb[:, :, h * dk:(h + 1) * dk]
        vh = vb[:, :, h * dv:(h + 1) * dv]

        sim = jnp.einsum('bqd,bnd->bqn', qh, kh,
                         preferred_element_type=jnp.float32)   # (bb, HW, n_l)
        sim = sim + add_mask
        smax = jnp.max(sim, axis=-1, keepdims=True)
        p = jnp.exp(sim - smax)
        denom = jnp.sum(p, axis=-1, keepdims=True)
        # approx reciprocal: softmax rows sum to 1 only to ~1e-3 relative.
        attn = p * pl.reciprocal(denom, approx=True)
        # Reference's v-mask folded exactly into the weights; also keeps the
        # all-masked-row (zero-length sequence) behavior identical to the reference.
        attn = attn * mrow

        ctx_heads.append(
            jnp.einsum('bqn,bnd->bqd', attn.astype(jnp.bfloat16), vh,
                       preferred_element_type=jnp.float32))    # (bb, HW, dv)

    ctx = ctx_heads[0] if H == 1 else jnp.concatenate(ctx_heads, axis=-1)  # (bb,HW,Vc)

    # ---- W: single Vc-deep output projection + InstanceNorm1d over HW ----
    ctx2 = ctx.astype(jnp.bfloat16).reshape(bb * HW, Vc)       # cast once
    o2 = jnp.dot(ctx2, wo_ref[...], preferred_element_type=jnp.float32) + bo_ref[...]
    o3 = o2.reshape(bb, HW, Co)
    om = jnp.mean(o3, axis=1, keepdims=True)
    ov = jnp.mean(jnp.square(o3 - om), axis=1, keepdims=True)
    o_ref[...] = ((o3 - om) * lax.rsqrt(ov + EPS)).astype(o_ref.dtype)


def _pick_batch_block(B, HW, n_l, Cv, Cl, Kc, Vc, Co, vmem_budget_bytes):
    """VMEM-budget-derived batch block that keeps several pipelined grid steps."""
    # Double-buffered input/output blocks (bf16 in, f32 out) per batch element:
    io_bytes = 2 * (HW * Cv * 2 + n_l * Cl * 2 + n_l * 4) + 2 * (HW * Co * 4)
    # Rough in-kernel f32/bf16 intermediates (q, k, v, sim, attn, ctx, out):
    interm_bytes = HW * (3 * Kc + 3 * Vc + 2 * Co) * 4 + 3 * HW * n_l * 4
    per_batch = io_bytes + interm_bytes
    # Shared weights/biases (double-buffered blocks):
    weight_bytes = 2 * 2 * (Cv * Kc + Cl * (Kc + Vc) + Vc * Co) \
                   + 2 * 4 * (2 * Kc + Vc + Co)
    budget = max(vmem_budget_bytes // 2 - weight_bytes, per_batch)
    cap = max(1, budget // per_batch)
    # Keep >= ~6 steps (>= 3 per TensorCore on v7x) when B allows, so the
    # BlockSpec double-buffering actually overlaps DMA with compute.
    min_steps = min(B, 6)
    best = 1
    for d in range(1, B + 1):
        if B % d == 0 and d <= cap and B // d >= min_steps:
            best = d
    return best


def spatial_image_language_attention(x, l, l_mask, params, *, num_heads,
                                     batch_block=None, out_dtype=jnp.float32,
                                     vmem_budget_bytes=32 * 1024 * 1024):
    B, HW, Cv = x.shape
    _, Cl, n_l = l.shape
    Kc = params["wq"].shape[1]
    Vc = params["wv"].shape[1]
    Co = params["wo"].shape[1]
    H = num_heads
    assert Kc % H == 0 and Vc % H == 0
    assert HW % 8 == 0, "HW must be a multiple of 8 (sublane-preserving reshape)"

    if batch_block is None:
        batch_block = _pick_batch_block(B, HW, n_l, Cv, Cl, Kc, Vc, Co,
                                        vmem_budget_bytes)
    steps = B // batch_block
    assert steps * batch_block == B

    cdt = jnp.bfloat16  # MXU operand dtype; accumulation stays f32
    xb = x.astype(cdt)                                            # (B, HW, Cv)
    ltb = jnp.transpose(l, (0, 2, 1)).astype(cdt)                 # (B, n_l, Cl)
    mrow = jnp.transpose(l_mask.astype(jnp.float32), (0, 2, 1))   # (B, 1, n_l)

    # Full-width weights (channel index = h*d + i matches the PyTorch reshapes).
    wq = params["wq"].astype(cdt)                                 # (Cv, Kc)
    wk = params["wk"].astype(cdt)                                 # (Cl, Kc)
    wv = params["wv"].astype(cdt)                                 # (Cl, Vc)
    wo = params["wo"].astype(cdt)                                 # (Vc, Co)
    bq = params["bq"].reshape(1, Kc).astype(jnp.float32)
    bk = params["bk"].reshape(1, Kc).astype(jnp.float32)
    bv = params["bv"].reshape(1, Vc).astype(jnp.float32)
    bo = params["bo"].reshape(1, Co).astype(jnp.float32)

    flops = 2 * B * (HW * Cv * Kc + n_l * Cl * (Kc + Vc)
                     + HW * n_l * (Kc + Vc) + HW * Vc * Co)
    bytes_accessed = ((xb.size + ltb.size) * 2 + mrow.size * 4
                      + steps * 2 * (wq.size + wk.size + wv.size + wo.size)
                      + steps * 4 * (bq.size + bk.size + bv.size + bo.size)
                      + B * HW * Co * jnp.dtype(out_dtype).itemsize)
    cost = pl.CostEstimate(flops=int(flops),
                           transcendentals=int(B * H * HW * (n_l + 1)),
                           bytes_accessed=int(bytes_accessed))

    def batched3(a, b):
        return pl.BlockSpec((batch_block, a, b), lambda s: (s, 0, 0))

    def shared2(a, b):
        return pl.BlockSpec((a, b), lambda s: (0, 0))

    return pl.pallas_call(
        partial(_silat_kernel, num_heads=H),
        out_shape=jax.ShapeDtypeStruct((B, HW, Co), out_dtype),
        grid_spec=pltpu.PrefetchScalarGridSpec(
            num_scalar_prefetch=0,
            grid=(steps,),
            in_specs=[
                batched3(HW, Cv),               # x (bf16)
                batched3(n_l, Cl),              # l transposed (bf16)
                batched3(1, n_l),               # row mask (f32)
                shared2(Cv, Kc), shared2(1, Kc),    # f_query conv
                shared2(Cl, Kc), shared2(1, Kc),    # f_key conv
                shared2(Cl, Vc), shared2(1, Vc),    # f_value conv
                shared2(Vc, Co), shared2(1, Co),    # W conv
            ],
            out_specs=batched3(HW, Co),
        ),
        compiler_params=pltpu.CompilerParams(
            dimension_semantics=("parallel",),
            vmem_limit_bytes=vmem_budget_bytes),
        cost_estimate=cost,
    )(xb, ltb, mrow, wq, bq, wk, bk, wv, bv, wo, bo)


def reference_forward(x, l, l_mask, p, *, num_heads):
    """Pure-JAX (f32) mirror of the PyTorch forward pass (for validation)."""
    B, HW, _ = x.shape
    Kc = p["wq"].shape[1]
    Vc = p["wv"].shape[1]
    dk, dv = Kc // num_heads, Vc // num_heads
    n_l = l.shape[-1]

    xt = jnp.transpose(x, (0, 2, 1))                                          # (B,Cv,HW)
    q = jnp.einsum("ck,bcn->bkn", p["wq"], xt) + p["bq"][None, :, None]
    qm = q.mean(axis=-1, keepdims=True)
    qv = jnp.square(q - qm).mean(axis=-1, keepdims=True)
    q = (q - qm) / jnp.sqrt(qv + EPS)
    q = jnp.transpose(q, (0, 2, 1))                                           # (B,HW,Kc)

    k = jnp.einsum("ck,bcn->bkn", p["wk"], l) + p["bk"][None, :, None]        # (B,Kc,n_l)
    v = jnp.einsum("ck,bcn->bkn", p["wv"], l) + p["bv"][None, :, None]        # (B,Vc,n_l)
    mt = jnp.transpose(l_mask, (0, 2, 1))                                     # (B,1,n_l)
    k = k * mt
    v = v * mt

    q = q.reshape(B, HW, num_heads, dk).transpose(0, 2, 1, 3)
    k = k.reshape(B, num_heads, dk, n_l)
    v = v.reshape(B, num_heads, dv, n_l)

    sim = jnp.einsum("bhqd,bhdn->bhqn", q, k) * (Kc ** -0.5)
    sim = sim + (10000.0 * mt[:, None] - 10000.0)
    sim = jax.nn.softmax(sim, axis=-1)
    out = jnp.einsum("bhqn,bhdn->bhqd", sim, v)
    out = out.transpose(0, 2, 1, 3).reshape(B, HW, Vc)
    out = jnp.transpose(out, (0, 2, 1))                                       # (B,Vc,HW)

    o = jnp.einsum("vk,bvn->bkn", p["wo"], out) + p["bo"][None, :, None]      # (B,Co,HW)
    om = o.mean(axis=-1, keepdims=True)
    ov = jnp.square(o - om).mean(axis=-1, keepdims=True)
    o = (o - om) / jnp.sqrt(ov + EPS)
    return jnp.transpose(o, (0, 2, 1))                                        # (B,HW,Co)


if __name__ == "__main__":
    # Small shapes consistent with the module's forward.
    B, HW = 2, 64              # HW = flattened 8x8 spatial
    v_in_channels = 32
    l_in_channels = 24
    key_channels = 32
    value_channels = 32
    out_channels = 32          # defaults to value_channels in the module
    num_heads = 2
    n_l = 8

    key = jax.random.PRNGKey(0)
    ks = jax.random.split(key, 12)

    def init_w(k, in_ch, out_ch):
        bound = 1.0 / (in_ch ** 0.5)
        return jax.random.uniform(k, (in_ch, out_ch), jnp.float32, -bound, bound)

    def init_b(k, in_ch, out_ch):
        bound = 1.0 / (in_ch ** 0.5)
        return jax.random.uniform(k, (out_ch,), jnp.float32, -bound, bound)

    params = {
        "wq": init_w(ks[0], v_in_channels, key_channels),
        "bq": init_b(ks[1], v_in_channels, key_channels),
        "wk": init_w(ks[2], l_in_channels, key_channels),
        "bk": init_b(ks[3], l_in_channels, key_channels),
        "wv": init_w(ks[4], l_in_channels, value_channels),
        "bv": init_b(ks[5], l_in_channels, value_channels),
        "wo": init_w(ks[6], value_channels, out_channels),
        "bo": init_b(ks[7], value_channels, out_channels),
    }

    x = jax.random.normal(ks[8], (B, HW, v_in_channels), jnp.float32)
    l = jax.random.normal(ks[9], (B, l_in_channels, n_l), jnp.float32)
    # Binary language mask: valid lengths 6 and 4 of the n_l=8 tokens.
    lengths = jnp.array([6, 4], dtype=jnp.int32)
    l_mask = (jnp.arange(n_l)[None, :] < lengths[:, None]).astype(jnp.float32)[..., None]

    out = spatial_image_language_attention(x, l, l_mask, params, num_heads=num_heads)
    out = jax.block_until_ready(out)

    ref = reference_forward(x, l, l_mask, params, num_heads=num_heads)
    err = float(jnp.max(jnp.abs(out - ref)))
    assert out.shape == (B, HW, out_channels)
    # bf16 MXU operands (f32 accumulation) + approx reciprocal introduce ~1e-2-scale
    # deviation vs the f32 reference.
    assert err < 1e-1, f"mismatch vs reference: max abs err = {err}"

    print("KERNEL_OK")
</pallas_src>

<mosaic_0001>
module attributes {stable_mosaic.version = 11 : i64} {
  func.func @_silat_kernel(%arg0: i32, %arg1: memref<1x64x32xbf16, #tpu.memory_space<vmem>>, %arg2: memref<1x8x24xbf16, #tpu.memory_space<vmem>>, %arg3: memref<1x1x8xf32, #tpu.memory_space<vmem>>, %arg4: memref<32x32xbf16, #tpu.memory_space<vmem>>, %arg5: memref<1x32xf32, #tpu.memory_space<vmem>>, %arg6: memref<24x32xbf16, #tpu.memory_space<vmem>>, %arg7: memref<1x32xf32, #tpu.memory_space<vmem>>, %arg8: memref<24x32xbf16, #tpu.memory_space<vmem>>, %arg9: memref<1x32xf32, #tpu.memory_space<vmem>>, %arg10: memref<32x32xbf16, #tpu.memory_space<vmem>>, %arg11: memref<1x32xf32, #tpu.memory_space<vmem>>, %arg12: memref<1x64x32xf32, #tpu.memory_space<vmem>>) attributes {dimension_semantics = [#tpu.dimension_semantics<parallel>], iteration_bounds = array<i64: 2>, scalar_prefetch = 0 : i64, scratch_operands = 0 : i64, tpu.core_type = #tpu.core_type<tc>, window_params = [{transform_indices = @transform_0, window_bounds = array<i64: 1, 64, 32>}, {transform_indices = @transform_1, window_bounds = array<i64: 1, 8, 24>}, {transform_indices = @transform_2, window_bounds = array<i64: 1, 1, 8>}, {pipeline_mode = #tpu.pipeline_mode<synchronous>, transform_indices = @transform_3, window_bounds = array<i64: 32, 32>}, {pipeline_mode = #tpu.pipeline_mode<synchronous>, transform_indices = @transform_4, window_bounds = array<i64: 1, 32>}, {pipeline_mode = #tpu.pipeline_mode<synchronous>, transform_indices = @transform_5, window_bounds = array<i64: 24, 32>}, {pipeline_mode = #tpu.pipeline_mode<synchronous>, transform_indices = @transform_6, window_bounds = array<i64: 1, 32>}, {pipeline_mode = #tpu.pipeline_mode<synchronous>, transform_indices = @transform_7, window_bounds = array<i64: 24, 32>}, {pipeline_mode = #tpu.pipeline_mode<synchronous>, transform_indices = @transform_8, window_bounds = array<i64: 1, 32>}, {pipeline_mode = #tpu.pipeline_mode<synchronous>, transform_indices = @transform_9, window_bounds = array<i64: 32, 32>}, {pipeline_mode = #tpu.pipeline_mode<synchronous>, transform_indices = @transform_10, window_bounds = array<i64: 1, 32>}, {transform_indices = @transform_11, window_bounds = array<i64: 1, 64, 32>}]} {
    %c0 = arith.constant 0 : index
    %c0_0 = arith.constant 0 : index
    %c0_1 = arith.constant 0 : index
    %0 = vector.load %arg1[%c0, %c0_0, %c0_1] : memref<1x64x32xbf16, #tpu.memory_space<vmem>>, vector<1x64x32xbf16>
    %1 = vector.shape_cast %0 : vector<1x64x32xbf16> to vector<64x32xbf16>
    %c0_2 = arith.constant 0 : index
    %c0_3 = arith.constant 0 : index
    %2 = vector.load %arg4[%c0_2, %c0_3] : memref<32x32xbf16, #tpu.memory_space<vmem>>, vector<32x32xbf16>
    %cst = arith.constant dense<0.000000e+00> : vector<64x32xf32>
    %3 = tpu.matmul %1, %2, %cst {dimension_numbers = #tpu.dot_dimension_numbers<[1], [0], [0], [1], [0, 0, 1, 1], [], []>} : vector<64x32xbf16>, vector<32x32xbf16>, vector<64x32xf32> -> vector<64x32xf32>
    %c0_4 = arith.constant 0 : index
    %c0_5 = arith.constant 0 : index
    %4 = vector.load %arg5[%c0_4, %c0_5] : memref<1x32xf32, #tpu.memory_space<vmem>>, vector<1x32xf32>
    %5 = vector.broadcast %4 : vector<1x32xf32> to vector<64x32xf32>
    %6 = arith.addf %3, %5 : vector<64x32xf32>
    %c0_6 = arith.constant 0 : index
    %c0_7 = arith.constant 0 : index
    %c0_8 = arith.constant 0 : index
    %7 = vector.load %arg2[%c0_6, %c0_7, %c0_8] : memref<1x8x24xbf16, #tpu.memory_space<vmem>>, vector<1x8x24xbf16>
    %8 = vector.shape_cast %7 : vector<1x8x24xbf16> to vector<8x24xbf16>
    %c0_9 = arith.constant 0 : index
    %c0_10 = arith.constant 0 : index
    %9 = vector.load %arg6[%c0_9, %c0_10] : memref<24x32xbf16, #tpu.memory_space<vmem>>, vector<24x32xbf16>
    %cst_11 = arith.constant dense<0.000000e+00> : vector<8x32xf32>
    %10 = tpu.matmul %8, %9, %cst_11 {dimension_numbers = #tpu.dot_dimension_numbers<[1], [0], [0], [1], [0, 0, 1, 1], [], []>} : vector<8x24xbf16>, vector<24x32xbf16>, vector<8x32xf32> -> vector<8x32xf32>
    %c0_12 = arith.constant 0 : index
    %c0_13 = arith.constant 0 : index
    %11 = vector.load %arg7[%c0_12, %c0_13] : memref<1x32xf32, #tpu.memory_space<vmem>>, vector<1x32xf32>
    %12 = vector.broadcast %11 : vector<1x32xf32> to vector<8x32xf32>
    %13 = arith.addf %10, %12 : vector<8x32xf32>
    %c0_14 = arith.constant 0 : index
    %c0_15 = arith.constant 0 : index
    %14 = vector.load %arg8[%c0_14, %c0_15] : memref<24x32xbf16, #tpu.memory_space<vmem>>, vector<24x32xbf16>
    %cst_16 = arith.constant dense<0.000000e+00> : vector<8x32xf32>
    %15 = tpu.matmul %8, %14, %cst_16 {dimension_numbers = #tpu.dot_dimension_numbers<[1], [0], [0], [1], [0, 0, 1, 1], [], []>} : vector<8x24xbf16>, vector<24x32xbf16>, vector<8x32xf32> -> vector<8x32xf32>
    %c0_17 = arith.constant 0 : index
    %c0_18 = arith.constant 0 : index
    %16 = vector.load %arg9[%c0_17, %c0_18] : memref<1x32xf32, #tpu.memory_space<vmem>>, vector<1x32xf32>
    %17 = vector.broadcast %16 : vector<1x32xf32> to vector<8x32xf32>
    %18 = arith.addf %15, %17 : vector<8x32xf32>
    %19 = vector.shape_cast %6 : vector<64x32xf32> to vector<1x64x32xf32>
    %cst_19 = arith.constant dense<0.000000e+00> : vector<1x32xf32>
    %20 = vector.multi_reduction <add>, %19, %cst_19 [1] : vector<1x64x32xf32> to vector<1x32xf32>
    %21 = vector.shape_cast %20 : vector<1x32xf32> to vector<1x1x32xf32>
    %cst_20 = arith.constant 6.400000e+01 : f32
    %22 = vector.broadcast %cst_20 : f32 to vector<1x1x32xf32>
    %23 = arith.divf %21, %22 : vector<1x1x32xf32>
    %24 = vector.broadcast %23 : vector<1x1x32xf32> to vector<1x64x32xf32>
    %25 = arith.subf %19, %24 : vector<1x64x32xf32>
    %26 = arith.mulf %25, %25 : vector<1x64x32xf32>
    %cst_21 = arith.constant dense<0.000000e+00> : vector<1x32xf32>
    %27 = vector.multi_reduction <add>, %26, %cst_21 [1] : vector<1x64x32xf32> to vector<1x32xf32>
    %28 = vector.shape_cast %27 : vector<1x32xf32> to vector<1x1x32xf32>
    %cst_22 = arith.constant 6.400000e+01 : f32
    %29 = vector.broadcast %cst_22 : f32 to vector<1x1x32xf32>
    %30 = arith.divf %28, %29 : vector<1x1x32xf32>
    %31 = vector.broadcast %23 : vector<1x1x32xf32> to vector<1x64x32xf32>
    %32 = arith.subf %19, %31 : vector<1x64x32xf32>
    %cst_23 = arith.constant 9.99999974E-6 : f32
    %33 = vector.broadcast %cst_23 : f32 to vector<1x1x32xf32>
    %34 = arith.addf %30, %33 : vector<1x1x32xf32>
    %35 = math.rsqrt %34 : vector<1x1x32xf32>
    %cst_24 = arith.constant 0.176776692 : f32
    %36 = vector.broadcast %cst_24 : f32 to vector<1x1x32xf32>
    %37 = arith.mulf %35, %36 : vector<1x1x32xf32>
    %38 = vector.broadcast %37 : vector<1x1x32xf32> to vector<1x64x32xf32>
    %39 = arith.mulf %32, %38 : vector<1x64x32xf32>
    %40 = arith.truncf %39 : vector<1x64x32xf32> to vector<1x64x32xbf16>
    %41 = vector.shape_cast %13 : vector<8x32xf32> to vector<1x8x32xf32>
    %42 = arith.truncf %41 : vector<1x8x32xf32> to vector<1x8x32xbf16>
    %43 = vector.shape_cast %18 : vector<8x32xf32> to vector<1x8x32xf32>
    %44 = arith.truncf %43 : vector<1x8x32xf32> to vector<1x8x32xbf16>
    %c0_25 = arith.constant 0 : index
    %c0_26 = arith.constant 0 : index
    %c0_27 = arith.constant 0 : index
    %45 = vector.load %arg3[%c0_25, %c0_26, %c0_27] : memref<1x1x8xf32, #tpu.memory_space<vmem>>, vector<1x1x8xf32>
    %cst_28 = arith.constant 1.000000e+04 : f32
    %46 = vector.broadcast %cst_28 : f32 to vector<1x1x8xf32>
    %47 = arith.mulf %46, %45 : vector<1x1x8xf32>
    %cst_29 = arith.constant 1.000000e+04 : f32
    %48 = vector.broadcast %cst_29 : f32 to vector<1x1x8xf32>
    %49 = arith.subf %47, %48 : vector<1x1x8xf32>
    %50 = vector.extract_strided_slice %40 {offsets = [0, 0, 0], sizes = [1, 64, 16], strides = [1, 1, 1]} : vector<1x64x32xbf16> to vector<1x64x16xbf16>
    %51 = vector.extract_strided_slice %42 {offsets = [0, 0, 0], sizes = [1, 8, 16], strides = [1, 1, 1]} : vector<1x8x32xbf16> to vector<1x8x16xbf16>
    %52 = vector.extract_strided_slice %44 {offsets = [0, 0, 0], sizes = [1, 8, 16], strides = [1, 1, 1]} : vector<1x8x32xbf16> to vector<1x8x16xbf16>
    "tpu.trace_start"() <{level = 10 : i32, message = "bqd,bnd->bqn"}> : () -> ()
    %cst_30 = arith.constant dense<0.000000e+00> : vector<1x64x8xf32>
    %53 = tpu.matmul %50, %51, %cst_30 {dimension_numbers = #tpu.dot_dimension_numbers<[2], [2], [1], [1], [0, 0, 0, 1, 1, 1], [0], [0]>} : vector<1x64x16xbf16>, vector<1x8x16xbf16>, vector<1x64x8xf32> -> vector<1x64x8xf32>
    "tpu.trace_stop"() : () -> ()
    %54 = vector.broadcast %49 : vector<1x1x8xf32> to vector<1x64x8xf32>
    %55 = arith.addf %53, %54 : vector<1x64x8xf32>
    %cst_31 = arith.constant dense<0xFF800000> : vector<1x64xf32>
    %56 = vector.multi_reduction <maximumf>, %55, %cst_31 [2] : vector<1x64x8xf32> to vector<1x64xf32>
    %57 = vector.shape_cast %56 : vector<1x64xf32> to vector<1x64x1xf32>
    %58 = vector.broadcast %57 : vector<1x64x1xf32> to vector<1x64x8xf32>
    %59 = arith.subf %55, %58 : vector<1x64x8xf32>
    %60 = math.exp %59 : vector<1x64x8xf32>
    %cst_32 = arith.constant dense<0.000000e+00> : vector<1x64xf32>
    %61 = vector.multi_reduction <add>, %60, %cst_32 [2] : vector<1x64x8xf32> to vector<1x64xf32>
    %62 = vector.shape_cast %61 : vector<1x64xf32> to vector<1x64x1xf32>
    %63 = tpu.reciprocal %62 {approx = true} : vector<1x64x1xf32> -> vector<1x64x1xf32>
    %64 = vector.broadcast %63 : vector<1x64x1xf32> to vector<1x64x8xf32>
    %65 = arith.mulf %60, %64 : vector<1x64x8xf32>
    %66 = vector.broadcast %45 : vector<1x1x8xf32> to vector<1x64x8xf32>
    %67 = arith.mulf %65, %66 : vector<1x64x8xf32>
    %68 = arith.truncf %67 : vector<1x64x8xf32> to vector<1x64x8xbf16>
    "tpu.trace_start"() <{level = 10 : i32, message = "bqn,bnd->bqd"}> : () -> ()
    %cst_33 = arith.constant dense<0.000000e+00> : vector<1x64x16xf32>
    %69 = tpu.matmul %68, %52, %cst_33 {dimension_numbers = #tpu.dot_dimension_numbers<[2], [1], [1], [2], [0, 0, 0, 1, 1, 2], [0], [0]>} : vector<1x64x8xbf16>, vector<1x8x16xbf16>, vector<1x64x16xf32> -> vector<1x64x16xf32>
    "tpu.trace_stop"() : () -> ()
    %70 = vector.extract_strided_slice %40 {offsets = [0, 0, 16], sizes = [1, 64, 16], strides = [1, 1, 1]} : vector<1x64x32xbf16> to vector<1x64x16xbf16>
    %71 = vector.extract_strided_slice %42 {offsets = [0, 0, 16], sizes = [1, 8, 16], strides = [1, 1, 1]} : vector<1x8x32xbf16> to vector<1x8x16xbf16>
    %72 = vector.extract_strided_slice %44 {offsets = [0, 0, 16], sizes = [1, 8, 16], strides = [1, 1, 1]} : vector<1x8x32xbf16> to vector<1x8x16xbf16>
    "tpu.trace_start"() <{level = 10 : i32, message = "bqd,bnd->bqn"}> : () -> ()
    %cst_34 = arith.constant dense<0.000000e+00> : vector<1x64x8xf32>
    %73 = tpu.matmul %70, %71, %cst_34 {dimension_numbers = #tpu.dot_dimension_numbers<[2], [2], [1], [1], [0, 0, 0, 1, 1, 1], [0], [0]>} : vector<1x64x16xbf16>, vector<1x8x16xbf16>, vector<1x64x8xf32> -> vector<1x64x8xf32>
    "tpu.trace_stop"() : () -> ()
    %74 = vector.broadcast %49 : vector<1x1x8xf32> to vector<1x64x8xf32>
    %75 = arith.addf %73, %74 : vector<1x64x8xf32>
    %cst_35 = arith.constant dense<0xFF800000> : vector<1x64xf32>
    %76 = vector.multi_reduction <maximumf>, %75, %cst_35 [2] : vector<1x64x8xf32> to vector<1x64xf32>
    %77 = vector.shape_cast %76 : vector<1x64xf32> to vector<1x64x1xf32>
    %78 = vector.broadcast %77 : vector<1x64x1xf32> to vector<1x64x8xf32>
    %79 = arith.subf %75, %78 : vector<1x64x8xf32>
    %80 = math.exp %79 : vector<1x64x8xf32>
    %cst_36 = arith.constant dense<0.000000e+00> : vector<1x64xf32>
    %81 = vector.multi_reduction <add>, %80, %cst_36 [2] : vector<1x64x8xf32> to vector<1x64xf32>
    %82 = vector.shape_cast %81 : vector<1x64xf32> to vector<1x64x1xf32>
    %83 = tpu.reciprocal %82 {approx = true} : vector<1x64x1xf32> -> vector<1x64x1xf32>
    %84 = vector.broadcast %83 : vector<1x64x1xf32> to vector<1x64x8xf32>
    %85 = arith.mulf %80, %84 : vector<1x64x8xf32>
    %86 = vector.broadcast %45 : vector<1x1x8xf32> to vector<1x64x8xf32>
    %87 = arith.mulf %85, %86 : vector<1x64x8xf32>
    %88 = arith.truncf %87 : vector<1x64x8xf32> to vector<1x64x8xbf16>
    "tpu.trace_start"() <{level = 10 : i32, message = "bqn,bnd->bqd"}> : () -> ()
    %cst_37 = arith.constant dense<0.000000e+00> : vector<1x64x16xf32>
    %89 = tpu.matmul %88, %72, %cst_37 {dimension_numbers = #tpu.dot_dimension_numbers<[2], [1], [1], [2], [0, 0, 0, 1, 1, 2], [0], [0]>} : vector<1x64x8xbf16>, vector<1x8x16xbf16>, vector<1x64x16xf32> -> vector<1x64x16xf32>
    "tpu.trace_stop"() : () -> ()
    %90 = tpu.concatenate %69, %89 in 2 : vector<1x64x16xf32>, vector<1x64x16xf32> -> vector<1x64x32xf32>
    %91 = arith.truncf %90 : vector<1x64x32xf32> to vector<1x64x32xbf16>
    %92 = vector.shape_cast %91 : vector<1x64x32xbf16> to vector<64x32xbf16>
    %c0_38 = arith.constant 0 : index
    %c0_39 = arith.constant 0 : index
    %93 = vector.load %arg10[%c0_38, %c0_39] : memref<32x32xbf16, #tpu.memory_space<vmem>>, vector<32x32xbf16>
    %cst_40 = arith.constant dense<0.000000e+00> : vector<64x32xf32>
    %94 = tpu.matmul %92, %93, %cst_40 {dimension_numbers = #tpu.dot_dimension_numbers<[1], [0], [0], [1], [0, 0, 1, 1], [], []>} : vector<64x32xbf16>, vector<32x32xbf16>, vector<64x32xf32> -> vector<64x32xf32>
    %c0_41 = arith.constant 0 : index
    %c0_42 = arith.constant 0 : index
    %95 = vector.load %arg11[%c0_41, %c0_42] : memref<1x32xf32, #tpu.memory_space<vmem>>, vector<1x32xf32>
    %96 = vector.broadcast %95 : vector<1x32xf32> to vector<64x32xf32>
    %97 = arith.addf %94, %96 : vector<64x32xf32>
    %98 = vector.shape_cast %97 : vector<64x32xf32> to vector<1x64x32xf32>
    %cst_43 = arith.constant dense<0.000000e+00> : vector<1x32xf32>
    %99 = vector.multi_reduction <add>, %98, %cst_43 [1] : vector<1x64x32xf32> to vector<1x32xf32>
    %100 = vector.shape_cast %99 : vector<1x32xf32> to vector<1x1x32xf32>
    %cst_44 = arith.constant 6.400000e+01 : f32
    %101 = vector.broadcast %cst_44 : f32 to vector<1x1x32xf32>
    %102 = arith.divf %100, %101 : vector<1x1x32xf32>
    %103 = vector.broadcast %102 : vector<1x1x32xf32> to vector<1x64x32xf32>
    %104 = arith.subf %98, %103 : vector<1x64x32xf32>
    %105 = arith.mulf %104, %104 : vector<1x64x32xf32>
    %cst_45 = arith.constant dense<0.000000e+00> : vector<1x32xf32>
    %106 = vector.multi_reduction <add>, %105, %cst_45 [1] : vector<1x64x32xf32> to vector<1x32xf32>
    %107 = vector.shape_cast %106 : vector<1x32xf32> to vector<1x1x32xf32>
    %cst_46 = arith.constant 6.400000e+01 : f32
    %108 = vector.broadcast %cst_46 : f32 to vector<1x1x32xf32>
    %109 = arith.divf %107, %108 : vector<1x1x32xf32>
    %110 = vector.broadcast %102 : vector<1x1x32xf32> to vector<1x64x32xf32>
    %111 = arith.subf %98, %110 : vector<1x64x32xf32>
    %cst_47 = arith.constant 9.99999974E-6 : f32
    %112 = vector.broadcast %cst_47 : f32 to vector<1x1x32xf32>
    %113 = arith.addf %109, %112 : vector<1x1x32xf32>
    %114 = math.rsqrt %113 : vector<1x1x32xf32>
    %115 = vector.broadcast %114 : vector<1x1x32xf32> to vector<1x64x32xf32>
    %116 = arith.mulf %111, %115 : vector<1x64x32xf32>
    %c0_48 = arith.constant 0 : index
    %c0_49 = arith.constant 0 : index
    %c0_50 = arith.constant 0 : index
    %117 = vector.load %arg12[%c0_48, %c0_49, %c0_50] : memref<1x64x32xf32, #tpu.memory_space<vmem>>, vector<1x64x32xf32>
    tpu.vector_store %arg12[%c0_48, %c0_49, %c0_50], %116 {strides = array<i32>} : memref<1x64x32xf32, #tpu.memory_space<vmem>>, vector<1x64x32xf32>,
    return
  }
  func.func @transform_0(%arg0: i32) -> (i32, i32, i32) {
    %c0_i32 = arith.constant 0 : i32
    %c0_i32_0 = arith.constant 0 : i32
    %c0_i32_1 = arith.constant 0 : i32
    return %arg0, %c0_i32, %c0_i32_0 : i32, i32, i32
  }
  func.func @transform_1(%arg0: i32) -> (i32, i32, i32) {
    %c0_i32 = arith.constant 0 : i32
    %c0_i32_0 = arith.constant 0 : i32
    %c0_i32_1 = arith.constant 0 : i32
    return %arg0, %c0_i32, %c0_i32_0 : i32, i32, i32
  }
  func.func @transform_2(%arg0: i32) -> (i32, i32, i32) {
    %c0_i32 = arith.constant 0 : i32
    %c0_i32_0 = arith.constant 0 : i32
    %c0_i32_1 = arith.constant 0 : i32
    return %arg0, %c0_i32, %c0_i32_0 : i32, i32, i32
  }
  func.func @transform_3(%arg0: i32) -> (i32, i32) {
    %c0_i32 = arith.constant 0 : i32
    %c0_i32_0 = arith.constant 0 : i32
    %c0_i32_1 = arith.constant 0 : i32
    return %c0_i32, %c0_i32_0 : i32, i32
  }
  func.func @transform_4(%arg0: i32) -> (i32, i32) {
    %c0_i32 = arith.constant 0 : i32
    %c0_i32_0 = arith.constant 0 : i32
    %c0_i32_1 = arith.constant 0 : i32
    return %c0_i32, %c0_i32_0 : i32, i32
  }
  func.func @transform_5(%arg0: i32) -> (i32, i32) {
    %c0_i32 = arith.constant 0 : i32
    %c0_i32_0 = arith.constant 0 : i32
    %c0_i32_1 = arith.constant 0 : i32
    return %c0_i32, %c0_i32_0 : i32, i32
  }
  func.func @transform_6(%arg0: i32) -> (i32, i32) {
    %c0_i32 = arith.constant 0 : i32
    %c0_i32_0 = arith.constant 0 : i32
    %c0_i32_1 = arith.constant 0 : i32
    return %c0_i32, %c0_i32_0 : i32, i32
  }
  func.func @transform_7(%arg0: i32) -> (i32, i32) {
    %c0_i32 = arith.constant 0 : i32
    %c0_i32_0 = arith.constant 0 : i32
    %c0_i32_1 = arith.constant 0 : i32
    return %c0_i32, %c0_i32_0 : i32, i32
  }
  func.func @transform_8(%arg0: i32) -> (i32, i32) {
    %c0_i32 = arith.constant 0 : i32
    %c0_i32_0 = arith.constant 0 : i32
    %c0_i32_1 = arith.constant 0 : i32
    return %c0_i32, %c0_i32_0 : i32, i32
  }
  func.func @transform_9(%arg0: i32) -> (i32, i32) {
    %c0_i32 = arith.constant 0 : i32
    %c0_i32_0 = arith.constant 0 : i32
    %c0_i32_1 = arith.constant 0 : i32
    return %c0_i32, %c0_i32_0 : i32, i32
  }
  func.func @transform_10(%arg0: i32) -> (i32, i32) {
    %c0_i32 = arith.constant 0 : i32
    %c0_i32_0 = arith.constant 0 : i32
    %c0_i32_1 = arith.constant 0 : i32
    return %c0_i32, %c0_i32_0 : i32, i32
  }
  func.func @transform_11(%arg0: i32) -> (i32, i32, i32) {
    %c0_i32 = arith.constant 0 : i32
    %c0_i32_0 = arith.constant 0 : i32
    %c0_i32_1 = arith.constant 0 : i32
    return %arg0, %c0_i32, %c0_i32_0 : i32, i32, i32
  }
}

</mosaic_0001>

<bundles_post_ra>
// kernel: tpu_custom_call.1
= control target key start
LH: loop header
LB: loop body
LE: loop exit
PB: predicated region body
PF: predicated region fallthrough
CT: control target
= control target key end

     0   :  { %s1976_s17 = smov 0   ;;  %s2335_s0 = inlined_call_operand.vmem [shape: bf16[2,64,32], index: 0, kind: input, shape index: {}]   ;;  %s2336_s1 = inlined_call_operand.vmem [shape: bf16[2,8,24], index: 1, kind: input, shape index: {}]   ;;  %s2337_s2 = inlined_call_operand.vmem [shape: f32[2,1,8], index: 2, kind: input, shape index: {}]   ;;  %s2338_s3 = inlined_call_operand.vmem [shape: bf16[32,32], index: 3, kind: input, shape index: {}]   ;;  %s2339_s4 = inlined_call_operand.vmem [shape: f32[1,32], index: 4, kind: input, shape index: {}]   ;;  %s2340_s5 = inlined_call_operand.vmem [shape: bf16[24,32], index: 5, kind: input, shape index: {}]   ;;  %s2341_s6 = inlined_call_operand.vmem [shape: f32[1,32], index: 6, kind: input, shape index: {}]   ;;  %s2342_s7 = inlined_call_operand.vmem [shape: bf16[24,32], index: 7, kind: input, shape index: {}]   ;;  %s2343_s8 = inlined_call_operand.vmem [shape: f32[1,32], index: 8, kind: input, shape index: {}]   ;;  %s2344_s9 = inlined_call_operand.vmem [shape: bf16[32,32], index: 9, kind: input, shape index: {}]   ;;  %s2345_s10 = inlined_call_operand.vmem [shape: f32[1,32], index: 10, kind: input, shape index: {}]   ;;  %s2346_s11 = inlined_call_operand.vmem [shape: f32[2,64,32], index: 11, kind: output, shape index: {}]  }
   0x1 LB: > { %s1609_s18 = sadd.s32 4294967295, %s1910_s17   ;;  %p1613_p0 = scmp.ge.s32.totalorder %s1910_s17, 1  ;;  %s1910_s17 = sphi %s1976_s17, %s21_s17  }
   0x2   : > { %p354_p1 = scmp.lt.s32.totalorder %s1910_s17, 3 }
   0x4   : > { %p355_p2 = pnand %p1613_p0, %p354_p1 }
   0x5   : > { %v1824_v0 = vld [vmem:[%s2338_s3] sm:$0xff] (!%p355_p2)   ;;  %p401_p3 = scmp.lt.s32.totalorder (!%p355_p2), %s1609_s18, 1  ;;  %v760_v1 = vlaneseq (!%p355_p2)  ;;  %v1825_v2 = vld [vmem:[%s2338_s3 + $0x8] sm:$0xff] (!%p355_p2)   ;;  %vm470_vm0 = vcmask (!%p355_p2), 261120   ;;  %v1912_v12 = vmov (!%p355_p2), 0.0   ;;  %vm572_vm1 = vcmask (!%p355_p2), 1043456  }
   0x6   : > { %358 = sbr.rel (%p355_p2) target bundleno = 1614 (0x64e), region = 64  ;;  %1704 = vmatprep.subr.bf16.mxu0 (!%p355_p2), %v1824_v0  ;;  %1784 = vmatprep.subr.bf16.mxu1 (!%p355_p2), %v1824_v0  ;;  %v1830_v8 = vld [vmem:[%s2340_s5] sm:$0xff] (!%p355_p2)   ;;  %v1831_v10 = vld [vmem:[%s2340_s5 + $0x8] ss:$0 sps:$4 sm:$0xff] (!%p355_p2)   ;;  %vm1913_vm2 = vmmov (!%p355_p2), 0   ;;  %vm568_vm3 = vcmask (!%p355_p2), 195584  }
   0x7   : > { %v1992_v3 = vshrl.u32 (!%p355_p2), %v760_v1, 7  ;;  %1705 = vmatpush3.bf16.msra.mxu0 (!%p355_p2), %v1824_v0  ;;  %1786 = vmatpush3.bf16.msra.mxu1 (!%p355_p2), %v1824_v0  ;;  %v574_v14 = vsel (!%p355_p2), %vm572_vm1, %v1831_v10, 0  ;;  %v1619_v16 = vld [vmem:[%s2339_s4] ss:$0 sm:$0xff] (!%p355_p2)  ;;  %vm765_vm4 = vcmask (!%p355_p2), 130048   ;;  %s1914_s25 = smov (!%p355_p2), 112  }
   0x8   : > { %1706 = vmatprep.subr.bf16.mxu0 (!%p355_p2), %v1825_v2  ;;  %1785 = vmatprep.subr.bf16.mxu1 (!%p355_p2), %v1825_v2  ;;  %v1630_v33 = vld [vmem:[%s2341_s6] ss:$0 sm:$0xff] (!%p355_p2)  ;;  %vm846_vm5 = vcmask (!%p355_p2), 64512   ;;  %s1915_s19 = smov (!%p355_p2), 16  }
   0x9   : > { %v762_v4 = vsub.s32 (!%p355_p2), 0, %v1992_v3 }
   0xb   : > { %1707 = vmatpush3.bf16.msra.mxu0 (!%p355_p2), %v1825_v2  ;;  %1787 = vmatpush3.bf16.msra.mxu1 (!%p355_p2), %v1825_v2 }
   0xc   : > { %1716 = vmatprep.subr.bf16.mxu1 (!%p355_p2), %v1912_v12 }
   0xd   : > { %s2348_s18 = smov (!%p401_p3, %s1609_s18), 1 }
   0xe   : > { %s1664_s23 = sshll.u32 %s2348_s18, 5  ;;  %s412_s26 = scalar_lea.vmem %s2337_s2, %s2348_s18 }
   0xf   : > { %s405_s29 = scalar_lea.vmem %s2335_s0, %s1664_s23  ;;  %v2003_v5 = vld [vmem:[%s412_s26] sm:$0x1]  ;;  %s1616_s15 = sshll.u32 %s2348_s18, 2 }
  0x10   : > { %v1826_v6 = vld [vmem:[%s405_s29] sm:$0xff]   ;;  %v2008_v7 = vrot.slane %v2003_v5, %v762_v4  ;;  %v1827_v9 = vld [vmem:[%s405_s29 + $0x8] sm:$0xff]   ;;  %v1828_v11 = vld [vmem:[%s405_s29 + $0x10] sm:$0xff]   ;;  %s409_s20 = scalar_lea.vmem %s2336_s1, %s1616_s15  ;;  %s1665_s22 = sshll.u32 %s2348_s18, 6 }
  0x11   : > { %1708 = vmatprep.mubr.msk.bf16.mxu0 %vm470_vm0, %v1826_v6  ;;  %v1829_v13 = vld [vmem:[%s405_s29 + $0x18] sm:$0xff]   ;;  %1712 = vmatprep.mubr.msk.bf16.mxu1 %vm470_vm0, %v1828_v11  ;;  %v2028_v15 = vld [vmem:[%s409_s20] sm:$0xf] }
  0x12   : > { %1709 = vmatmul.mubr.msk.bf16.vlgmr.msra.gmra.mrb[0].mxu0 %vm470_vm0, %v1827_v9  ;;  %1713 = vmatmul.mubr.msk.bf16.vlgmr.msra.gmra.mrb[0].mxu1 %vm470_vm0, %v1829_v13 }
  0x13   : > { %1717 = vmatpush3.bf16.msra.mxu1 %v1830_v8  ;;  %1720 = vmatprep.mubr.msk.bf16.mxu1 %vm1913_vm2, %v1912_v12 }
  0x14   : > { %1718 = vmatprep.subr.bf16.mxu1 %v1912_v12 }
  0x17   : > { %1719 = vmatpush3.bf16.msra.mxu1 %v574_v14 }
  0x18   : > { %1724 = vmatprep.subr.bf16.mxu1 %v1912_v12 }
  0x1a   : > { %1721 = vmatmul.mubr.msk.bf16.vlgmr.msra.gmra.mrb[4].mxu1 %vm568_vm3, %v2028_v15 }
  0x1b   : > { %1728 = vmatprep.mubr.msk.bf16.mxu1 %vm1913_vm2, %v1912_v12 }
  0xe5   : > { %v1710_v17 = vpop.f32.mrb[0].mxu0  ;;  %v1714_v19 = vpop.f32.mrb[0].mxu1 }
  0xe6   : > { %v517_v18 = vpop.f32.mrb[1].mxu0  ;;  %v533_v22 = vpop.f32.mrb[1].mxu1  ;;  %v526_v25 = vadd.f32 %v1710_v17, %v1619_v16  ;;  %v542_v44 = vadd.f32 %v1714_v19, %v1619_v16 }
  0xe7   : > { %v518_v20 = vadd.f32 %v1619_v16, %v517_v18  ;;  %v1711_v21 = vpop.f32.mrb[2].mxu0  ;;  %v1715_v24 = vpop.f32.mrb[2].mxu1  ;;  %v534_v31 = vadd.f32 %v1619_v16, %v533_v22 }
  0xe8   : > { %v520_v23 = vpop.f32.mrb[3].mxu0  ;;  %v536_v27 = vpop.f32.mrb[3].mxu1  ;;  %v529_v29 = vadd.f32 %v1711_v21, %v1619_v16  ;;  %v681_v34 = vsel %vm470_vm0, %v526_v25, 0.0  ;;  %v545_v48 = vadd.f32 %v1715_v24, %v1619_v16  ;;  %v689_v52 = vsel %vm470_vm0, %v542_v44, 0.0 }
  0xe9   : > { %v521_v26 = vadd.f32 %v1619_v16, %v520_v23  ;;  %v678_v28 = vsel %vm470_vm0, %v518_v20, 0.0  ;;  %v685_v38 = vsel %vm470_vm0, %v534_v31, 0.0  ;;  %v537_v39 = vadd.f32 %v1619_v16, %v536_v27 }
  0xea   : > { %v683_v37 = vsel %vm470_vm0, %v529_v29, 0.0  ;;  %v691_v54 = vsel %vm470_vm0, %v545_v48, 0.0 }
  0xeb   : > { %v679_v30 = vsel %vm470_vm0, %v521_v26, 0.0  ;;  %v687_v49 = vsel %vm470_vm0, %v537_v39, 0.0 }
  0xec   : > { %v680_v32 = vadd.f32 %v679_v30, %v678_v28 }
  0xed   : > { %v610_v36 = vpop.f32.mrb[4].mxu1 }
  0xee   : > { %v682_v35 = vadd.f32 %v681_v34, %v680_v32  ;;  %v611_v40 = vadd.f32 %v1630_v33, %v610_v36  ;;  %v1722_v41 = vpop.f32.mrb[5].mxu1 }
  0xef   : > { %v613_v43 = vpop.f32.mrb[6].mxu1 }
  0xf0   : > { %v684_v42 = vadd.f32 %v683_v37, %v682_v35  ;;  %v754_v45 = vpack.c.bf16 %v611_v40, %v611_v40  ;;  %v1723_v46 = vpop.f32.mrb[7].mxu1 }
  0xf2   : > { %v686_v47 = vadd.f32 %v685_v38, %v684_v42  ;;  %1046 = vrot.lane.b32.xlu0 %v754_v45, %s1914_s25  ;;  %1788 = vmatprep.subr.msk.bf16.mxu0 %vm765_vm4, %v754_v45  ;;  %v779_v50 = vsel %vm765_vm4, %v754_v45, 0 }
  0xf3   : > { %1733 = vmatpush3.bf16.xpose.msra.mxu0 %v779_v50 }
  0xf4   : > { %v688_v51 = vadd.f32 %v687_v49, %v686_v47 }
  0xf6   : > { %v690_v53 = vadd.f32 %v689_v52, %v688_v51 }
  0xf8   : > { %v692_v55 = vadd.f32 %v691_v54, %v690_v53 }
  0xfa   : > { %v693_v56 = vrot.slane %v692_v55, 4 }
  0xfc   : > { %v694_v57 = vadd.f32 %v693_v56, %v692_v55 }
  0xfe   : > { %v695_v58 = vrot.slane %v694_v57, 2 }
 0x100   : > { %v696_v59 = vadd.f32 %v695_v58, %v694_v57 }
 0x102   : > { %v697_v60 = vrot.slane %v696_v59, 1 }
 0x104   : > { %v698_v61 = vadd.f32 %v697_v60, %v696_v59  ;;  %v1832_v60 = vld [vmem:[%s2342_s7] sm:$0xff]  }
 0x105   : > { %1725 = vmatpush3.bf16.msra.mxu1 %v1832_v60 }
 0x106   : > { %v700_v62 = vmul.f32 0.015625, %v698_v61  ;;  %v1833_v61 = vld [vmem:[%s2342_s7 + $0x8] ss:$0 sps:$4 sm:$0xff]   ;;  %1726 = vmatprep.subr.bf16.mxu1 %v1912_v12  ;;  %v757_v12 = vmul.f32 10000.0, %v2003_v5 }
 0x108   : > { %v701_v63 = vsub.f32 %v518_v20, %v700_v62  ;;  %v702_v0 = vsub.f32 %v521_v26, %v700_v62  ;;  %v703_v1 = vsub.f32 %v526_v25, %v700_v62  ;;  %v704_v2 = vsub.f32 %v529_v29, %v700_v62 }
 0x109   : > { %v705_v6 = vsub.f32 %v534_v31, %v700_v62  ;;  %v706_v8 = vsub.f32 %v537_v39, %v700_v62  ;;  %v707_v9 = vsub.f32 %v542_v44, %v700_v62  ;;  %v708_v10 = vsub.f32 %v545_v48, %v700_v62 }
 0x10a   : > { %v709_v11 = vmul.f32 %v701_v63, %v701_v63  ;;  %v710_v13 = vmul.f32 %v702_v0, %v702_v0  ;;  %v711_v14 = vmul.f32 %v703_v1, %v703_v1  ;;  %v712_v16 = vmul.f32 %v704_v2, %v704_v2 }
 0x10b   : > { %v713_v21 = vmul.f32 %v705_v6, %v705_v6  ;;  %v714_v23 = vmul.f32 %v706_v8, %v706_v8  ;;  %v715_v26 = vmul.f32 %v707_v9, %v707_v9  ;;  %v716_v29 = vmul.f32 %v708_v10, %v708_v10 }
 0x10c   : > { %v717_v17 = vsel %vm470_vm0, %v709_v11, 0.0  ;;  %v718_v18 = vsel %vm470_vm0, %v710_v13, 0.0  ;;  %v720_v22 = vsel %vm470_vm0, %v711_v14, 0.0  ;;  %v722_v24 = vsel %vm470_vm0, %v712_v16, 0.0 }
 0x10d   : > { %v719_v19 = vadd.f32 %v718_v18, %v717_v17  ;;  %v724_v27 = vsel %vm470_vm0, %v713_v21, 0.0  ;;  %v726_v30 = vsel %vm470_vm0, %v714_v23, 0.0  ;;  %v728_v32 = vsel %vm470_vm0, %v715_v26, 0.0 }
 0x10e   : > { %v730_v34 = vsel %vm470_vm0, %v716_v29, 0.0  ;;  %v636_v62 = vsel %vm572_vm1, %v1833_v61, 0 }
 0x10f   : > { %v721_v20 = vadd.f32 %v720_v22, %v719_v19  ;;  %1727 = vmatpush3.bf16.msra.mxu1 %v636_v62 }
 0x111   : > { %v723_v25 = vadd.f32 %v722_v24, %v721_v20 }
 0x112   : > { %1729 = vmatmul.mubr.msk.bf16.vlgmr.msra.gmra.mrb[8].mxu1 %vm568_vm3, %v2028_v15 }
 0x113   : > { %v725_v28 = vadd.f32 %v724_v27, %v723_v25 }
 0x115   : > { %v727_v31 = vadd.f32 %v726_v30, %v725_v28 }
 0x117   : > { %v729_v33 = vadd.f32 %v728_v32, %v727_v31 }
 0x119   : > { %v731_v35 = vadd.f32 %v730_v34, %v729_v33 }
 0x11b   : > { %v732_v36 = vrot.slane %v731_v35, 4 }
 0x11d   : > { %v733_v37 = vadd.f32 %v732_v36, %v731_v35 }
 0x11f   : > { %v734_v38 = vrot.slane %v733_v37, 2 }
 0x121   : > { %v735_v39 = vadd.f32 %v734_v38, %v733_v37 }
 0x123   : > { %v736_v40 = vrot.slane %v735_v39, 1 }
 0x125   : > { %v737_v41 = vadd.f32 %v736_v40, %v735_v39 }
 0x127   : > { %v738_v42 = vmul.f32 0.015625, %v737_v41 }
 0x129   : > { %v739_v43 = vadd.f32 1e-05, %v738_v42 }
 0x12b   : > { %1836 = vrsqrt.f32 %v739_v43 }
 0x135   : > { %v1837_v44 = vpop.eup %1836 }
 0x136   : > { %v741_v45 = vmul.f32 0.17677669, %v1837_v44 }
 0x138   : > { %v746_v46 = vmul.f32 %v741_v45, %v705_v6  ;;  %v747_v47 = vmul.f32 %v741_v45, %v706_v8  ;;  %v744_v48 = vmul.f32 %v741_v45, %v703_v1  ;;  %v745_v49 = vmul.f32 %v741_v45, %v704_v2 }
 0x139   : > { %v742_v50 = vmul.f32 %v741_v45, %v701_v63  ;;  %v743_v51 = vmul.f32 %v741_v45, %v702_v0  ;;  %v748_v52 = vmul.f32 %v741_v45, %v707_v9  ;;  %v749_v53 = vmul.f32 %v741_v45, %v708_v10 }
 0x13a   : > { %v752_v54 = vpack.c.bf16 %v747_v47, %v746_v46  ;;  %v751_v55 = vpack.c.bf16 %v745_v49, %v744_v48  ;;  %v1638_v6 = vadd.f32 -10000.0, %v757_v12 }
 0x13b   : > { %v750_v56 = vpack.c.bf16 %v743_v51, %v742_v50  ;;  %v753_v57 = vpack.c.bf16 %v749_v53, %v748_v52 }
 0x13c   : > { %1039 = vrot.lane.b32.xlu1 %v751_v55, %s1914_s25  ;;  %v763_v8 = vrot.slane %v1638_v6, %v762_v4 }
 0x13d   : > { %1037 = vrot.lane.b32.xlu0 %v750_v56, %s1914_s25  ;;  %1734 = vmatprep.mubr.msk.bf16.mxu0 %vm765_vm4, %v750_v56 }
 0x13e   : > { %1735 = vmatmul.mubr.msk.bf16.vlgmr.msra.gmra.mrb[4].mxu0 %vm765_vm4, %v751_v55 }
 0x13f   : > { %1738 = vmatprep.mubr.msk.bf16.mxu0 %vm765_vm4, %v752_v54 }
 0x140   : > { %1041 = vrot.lane.b32.xlu1 %v752_v54, %s1914_s25 }
 0x141   : > { %1043 = vrot.lane.b32.xlu0 %v753_v57, %s1914_s25 }
 0x146   : > { %1739 = vmatmul.mubr.msk.bf16.gmra.mrb[8].mxu0 %vm765_vm4, %v753_v57 }
 0x164   : > { %v1047_v58 = vpop.permute.xlu0 %1046 }
 0x165   : > { %v1061_v59 = vsel %vm765_vm4, %v1047_v58, 0  ;;  %1790 = vmatprep.subr.msk.bf16.mxu0 %vm765_vm4, %v1047_v58 }
 0x166   : > { %1753 = vmatpush3.bf16.xpose.msra.mxu0 %v1061_v59 }
 0x1ae   : > { %v1040_v63 = vpop.permute.xlu1 %1039 }
 0x1af   : > { %v1038_v0 = vpop.permute.xlu0 %1037 }
 0x1b0   : > { %1754 = vmatprep.mubr.msk.bf16.mxu0 %vm765_vm4, %v1038_v0 }
 0x1b1   : > { %1755 = vmatmul.mubr.msk.bf16.vlgmr.msra.gmra.mrb[12].mxu0 %vm765_vm4, %v1040_v63 }
 0x1b2   : > { %v1042_v1 = vpop.permute.xlu1 %1041 }
 0x1b3   : > { %1758 = vmatprep.mubr.msk.bf16.mxu0 %vm765_vm4, %v1042_v1  ;;  %v1044_v2 = vpop.permute.xlu0 %1043 }
 0x1b9   : > { %1759 = vmatmul.mubr.msk.bf16.gmra.mrb[16].mxu0 %vm765_vm4, %v1044_v2 }
 0x211   : > { %v1736_v9 = vpop.f32.mrb[4].mxu0 }
 0x212   : > { %v815_v15 = vpop.f32.mrb[5].mxu0  ;;  %v2094_v5 = vadd.f32 %v1736_v9, %v763_v8 }
 0x213   : > { %v2086_v10 = vadd.f32 %v815_v15, %v763_v8  ;;  %v1737_v11 = vpop.f32.mrb[6].mxu0 }
 0x214   : > { %v818_v13 = vpop.f32.mrb[7].mxu0  ;;  %v2088_v14 = vadd.f32 %v1737_v11, %v763_v8  ;;  %v853_v20 = vsel %vm846_vm5, %v2094_v5, -inf }
 0x215   : > { %v2090_v16 = vadd.f32 %v818_v13, %v763_v8  ;;  %v847_v17 = vsel %vm846_vm5, %v2086_v10, -inf }
 0x216   : > { %848 = vmax.xlane.f32.xlu1 %v847_v17  ;;  %v856_v18 = vsel %vm846_vm5, %v2088_v14, -inf }
 0x217   : > { %v850_v3 = vsel %vm846_vm5, %v2090_v16, -inf }
 0x218   : > { %851 = vmax.xlane.f32.xlu0 %v850_v3 }
 0x219   : > { %v1740_v4 = vpop.f32.mrb[8].mxu0 }
 0x21a   : > { %v831_v19 = vpop.f32.mrb[9].mxu0  ;;  %857 = vmax.xlane.f32.xlu1 %v856_v18  ;;  %v2106_v25 = vadd.f32 %v1740_v4, %v763_v8 }
 0x21b   : > { %v2100_v21 = vadd.f32 %v831_v19, %v763_v8  ;;  %v1741_v22 = vpop.f32.mrb[10].mxu0 }
 0x21c   : > { %v834_v23 = vpop.f32.mrb[11].mxu0  ;;  %854 = vmax.xlane.f32.xlu0 %v853_v20  ;;  %v2108_v26 = vadd.f32 %v1741_v22, %v763_v8  ;;  %v865_v29 = vsel %vm846_vm5, %v2106_v25, -inf }
 0x21d   : > { %v2104_v24 = vadd.f32 %v834_v23, %v763_v8  ;;  %v859_v27 = vsel %vm846_vm5, %v2100_v21, -inf }
 0x21e   : > { %v868_v30 = vsel %vm846_vm5, %v2108_v26, -inf }
 0x21f   : > { %v862_v28 = vsel %vm846_vm5, %v2104_v24, -inf }
 0x220   : > { %860 = vmax.xlane.f32.xlu0 %v859_v27  ;;  %863 = vmax.xlane.f32.xlu1 %v862_v28 }
 0x224   : > { %866 = vmax.xlane.f32.xlu0 %v865_v29  ;;  %869 = vmax.xlane.f32.xlu1 %v868_v30 }
 0x284   : > { %v1756_v31 = vpop.f32.mrb[12].mxu0 }
 0x285   : > { %v1097_v32 = vpop.f32.mrb[13].mxu0  ;;  %v2120_v36 = vadd.f32 %v1756_v31, %v763_v8 }
 0x286   : > { %v2118_v33 = vadd.f32 %v1097_v32, %v763_v8  ;;  %v1757_v34 = vpop.f32.mrb[14].mxu0  ;;  %v672_v32 = vpop.f32.mrb[8].mxu1 }
 0x287   : > { %v1100_v35 = vpop.f32.mrb[15].mxu0  ;;  %v2126_v39 = vadd.f32 %v1757_v34, %v763_v8  ;;  %v1134_v42 = vsel %vm846_vm5, %v2120_v36, -inf  ;;  %v1730_v34 = vpop.f32.mrb[9].mxu1 }
 0x288   : > { %v2122_v37 = vadd.f32 %v1100_v35, %v763_v8  ;;  %v1128_v38 = vsel %vm846_vm5, %v2118_v33, -inf  ;;  %v675_v35 = vpop.f32.mrb[10].mxu1 }
 0x289   : > { %1129 = vmax.xlane.f32.xlu0 %v1128_v38  ;;  %v1137_v46 = vsel %vm846_vm5, %v2126_v39, -inf  ;;  %v1634_v38 = vld [vmem:[%s2343_s8] ss:$0 sm:$0xff] }
 0x28a   : > { %v1131_v40 = vsel %vm846_vm5, %v2122_v37, -inf }
 0x28b   : > { %1132 = vmax.xlane.f32.xlu1 %v1131_v40  ;;  %v1731_v40 = vpop.f32.mrb[11].mxu1 }
 0x28c   : > { %v1760_v41 = vpop.f32.mrb[16].mxu0 }
 0x28d   : > { %v1113_v43 = vpop.f32.mrb[17].mxu0  ;;  %1135 = vmax.xlane.f32.xlu0 %v1134_v42  ;;  %v2136_v48 = vadd.f32 %v1760_v41, %v763_v8  ;;  %v673_v41 = vadd.f32 %v1634_v38, %v672_v32 }
 0x28e   : > { %v2132_v44 = vadd.f32 %v1113_v43, %v763_v8  ;;  %v1761_v45 = vpop.f32.mrb[18].mxu0 }
 0x28f   : > { %v1116_v47 = vpop.f32.mrb[19].mxu0  ;;  %1138 = vmax.xlane.f32.xlu1 %v1137_v46  ;;  %v2142_v51 = vadd.f32 %v1761_v45, %v763_v8  ;;  %v1146_v53 = vsel %vm846_vm5, %v2136_v48, -inf  ;;  %v2193_v42 = vpack.c.bf16 %v673_v41, %v673_v41 }
 0x290   : > { %v2138_v49 = vadd.f32 %v1116_v47, %v763_v8  ;;  %v1140_v50 = vsel %vm846_vm5, %v2132_v44, -inf }
 0x291   : > { %1141 = vmax.xlane.f32.xlu0 %v1140_v50  ;;  %v1149_v54 = vsel %vm846_vm5, %v2142_v51, -inf  ;;  %1789 = vmatprep.subr.msk.bf16.mxu1 %vm572_vm1, %v2193_v42  ;;  %v966_v43 = vsel %vm572_vm1, %v2193_v42, 0 }
 0x292   : > { %v1143_v52 = vsel %vm846_vm5, %v2138_v49, -inf  ;;  %1743 = vmatpush3.bf16.msra.mxu1 %v966_v43 }
 0x293   : > { %1144 = vmax.xlane.f32.xlu1 %v1143_v52 }
 0x295   : > { %1147 = vmax.xlane.f32.xlu0 %v1146_v53 }
 0x297   : > { %1150 = vmax.xlane.f32.xlu1 %v1149_v54 }
 0x2a3   : > { %v849_v55 = vpop.xlane.xlu1 %848 }
 0x2a4   : > { %v871_v59 = vsub.f32 %v2086_v10, %v849_v55 }
 0x2a5   : > { %v852_v56 = vpop.xlane.xlu0 %851 }
 0x2a6   : > { %v872_v57 = vsub.f32 %v2090_v16, %v852_v56  ;;  %v879_v1 = vmul.f32 1.442695, %v871_v59 }
 0x2a7   : > { %v858_v58 = vpop.xlane.xlu1 %857 }
 0x2a8   : > { %v881_v60 = vmul.f32 1.442695, %v872_v57  ;;  %v874_v61 = vsub.f32 %v2088_v14, %v858_v58 }
 0x2a9   : > { %v855_v62 = vpop.xlane.xlu0 %854 }
 0x2aa   : > { %1838 = vpow2.f32 %v881_v60  ;;  %v885_v63 = vmul.f32 1.442695, %v874_v61  ;;  %v873_v0 = vsub.f32 %v2094_v5, %v855_v62 }
 0x2ac   : > { %1840 = vpow2.f32 %v885_v63  ;;  %v883_v2 = vmul.f32 1.442695, %v873_v0 }
 0x2ad   : > { %v861_v12 = vpop.xlane.xlu0 %860  ;;  %v864_v6 = vpop.xlane.xlu1 %863 }
 0x2ae   : > { %1842 = vpow2.f32 %v883_v2  ;;  %v876_v8 = vsub.f32 %v2104_v24, %v864_v6  ;;  %v875_v9 = vsub.f32 %v2100_v21, %v861_v12 }
 0x2af   : > { %1844 = vpow2.f32 %v879_v1 }
 0x2b0   : > { %v889_v15 = vmul.f32 1.442695, %v876_v8  ;;  %v887_v17 = vmul.f32 1.442695, %v875_v9 }
 0x2b1   : > { %v867_v10 = vpop.xlane.xlu0 %866  ;;  %v870_v11 = vpop.xlane.xlu1 %869 }
 0x2b2   : > { %v877_v13 = vsub.f32 %v2106_v25, %v867_v10  ;;  %v878_v14 = vsub.f32 %v2108_v26, %v870_v11  ;;  %1846 = vpow2.f32 %v889_v15 }
 0x2b4   : > { %v2158_v16 = vpop.eup %1838  ;;  %v891_v5 = vmul.f32 1.442695, %v877_v13  ;;  %v893_v3 = vmul.f32 1.442695, %v878_v14 }
 0x2b5   : > { %v898_v4 = vsel %vm846_vm5, %v2158_v16, 0.0 }
 0x2b6   : > { %v2162_v18 = vpop.eup %1840  ;;  %1848 = vpow2.f32 %v891_v5  ;;  %899 = vadd.xlane.f32.xlu1 %v898_v4 }
 0x2b7   : > { %1850 = vpow2.f32 %v893_v3  ;;  %v904_v22 = vsel %vm846_vm5, %v2162_v18, 0.0 }
 0x2b8   : > { %v2164_v19 = vpop.eup %1842  ;;  %1852 = vpow2.f32 %v887_v17 }
 0x2b9   : > { %v901_v21 = vsel %vm846_vm5, %v2164_v19, 0.0  ;;  %v2170_v20 = vpop.eup %1844 }
 0x2ba   : > { %902 = vadd.xlane.f32.xlu0 %v901_v21  ;;  %905 = vadd.xlane.f32.xlu1 %v904_v22  ;;  %v895_v24 = vsel %vm846_vm5, %v2170_v20, 0.0 }
 0x2bc   : > { %v2172_v23 = vpop.eup %1846 }
 0x2bd   : > { %v910_v25 = vsel %vm846_vm5, %v2172_v23, 0.0 }
 0x2be   : > { %896 = vadd.xlane.f32.xlu0 %v895_v24  ;;  %911 = vadd.xlane.f32.xlu1 %v910_v25 }
 0x2c0   : > { %v2178_v26 = vpop.eup %1848 }
 0x2c1   : > { %v2180_v27 = vpop.eup %1850  ;;  %v913_v28 = vsel %vm846_vm5, %v2178_v26, 0.0 }
 0x2c2   : > { %v2184_v29 = vpop.eup %1852  ;;  %914 = vadd.xlane.f32.xlu0 %v913_v28  ;;  %v916_v30 = vsel %vm846_vm5, %v2180_v27, 0.0 }
 0x2c3   : > { %917 = vadd.xlane.f32.xlu1 %v916_v30  ;;  %v907_v31 = vsel %vm846_vm5, %v2184_v29, 0.0 }
 0x2c6   : > { %908 = vadd.xlane.f32.xlu0 %v907_v31 }
 0x316   : > { %v1130_v45 = vpop.xlane.xlu0 %1129 }
 0x317   : > { %v1152_v46 = vsub.f32 %v2118_v33, %v1130_v45 }
 0x318   : > { %v1133_v47 = vpop.xlane.xlu1 %1132 }
 0x319   : > { %v1153_v50 = vsub.f32 %v2122_v37, %v1133_v47  ;;  %v1160_v55 = vmul.f32 1.442695, %v1152_v46 }
 0x31a   : > { %v1136_v52 = vpop.xlane.xlu0 %1135 }
 0x31b   : > { %v1162_v53 = vmul.f32 1.442695, %v1153_v50  ;;  %v1154_v54 = vsub.f32 %v2120_v36, %v1136_v52 }
 0x31c   : > { %v1139_v56 = vpop.xlane.xlu1 %1138 }
 0x31d   : > { %1854 = vpow2.f32 %v1162_v53  ;;  %v1164_v57 = vmul.f32 1.442695, %v1154_v54  ;;  %v1155_v58 = vsub.f32 %v2126_v39, %v1139_v56 }
 0x31e   : > { %v1142_v59 = vpop.xlane.xlu0 %1141 }
 0x31f   : > { %1856 = vpow2.f32 %v1164_v57  ;;  %v1166_v60 = vmul.f32 1.442695, %v1155_v58  ;;  %v1156_v61 = vsub.f32 %v2132_v44, %v1142_v59 }
 0x320   : > { %1858 = vpow2.f32 %v1160_v55  ;;  %v1145_v33 = vpop.xlane.xlu1 %1144 }
 0x321   : > { %1860 = vpow2.f32 %v1166_v60  ;;  %v1157_v37 = vsub.f32 %v2138_v49, %v1145_v33  ;;  %v1168_v0 = vmul.f32 1.442695, %v1156_v61 }
 0x322   : > { %v1148_v62 = vpop.xlane.xlu0 %1147 }
 0x323   : > { %v1170_v63 = vmul.f32 1.442695, %v1157_v37  ;;  %v1158_v36 = vsub.f32 %v2136_v48, %v1148_v62 }
 0x324   : > { %v1151_v1 = vpop.xlane.xlu1 %1150 }
 0x325   : > { %1862 = vpow2.f32 %v1170_v63  ;;  %v1172_v2 = vmul.f32 1.442695, %v1158_v36  ;;  %v1159_v39 = vsub.f32 %v2142_v51, %v1151_v1 }
 0x327   : > { %v2207_v12 = vpop.eup %1854  ;;  %1864 = vpow2.f32 %v1172_v2  ;;  %v1174_v6 = vmul.f32 1.442695, %v1159_v39 }
 0x328   : > { %1866 = vpow2.f32 %v1168_v0  ;;  %v1179_v44 = vsel %vm846_vm5, %v2207_v12, 0.0 }
 0x329   : > { %v2211_v8 = vpop.eup %1856  ;;  %1868 = vpow2.f32 %v1174_v6  ;;  %1180 = vadd.xlane.f32.xlu1 %v1179_v44 }
 0x32a   : > { %v2213_v49 = vpop.eup %1858  ;;  %v1182_v48 = vsel %vm846_vm5, %v2211_v8, 0.0 }
 0x32b   : > { %v2217_v9 = vpop.eup %1860  ;;  %1183 = vadd.xlane.f32.xlu0 %v1182_v48  ;;  %v1176_v15 = vsel %vm846_vm5, %v2213_v49, 0.0 }
 0x32c   : > { %v1185_v51 = vsel %vm846_vm5, %v2217_v9, 0.0 }
 0x32d   : > { %1186 = vadd.xlane.f32.xlu1 %v1185_v51 }
 0x32f   : > { %v2223_v10 = vpop.eup %1862  ;;  %1177 = vadd.xlane.f32.xlu0 %v1176_v15 }
 0x330   : > { %v1191_v11 = vsel %vm846_vm5, %v2223_v10, 0.0 }
 0x331   : > { %v2227_v13 = vpop.eup %1864  ;;  %1192 = vadd.xlane.f32.xlu1 %v1191_v11 }
 0x332   : > { %v2229_v14 = vpop.eup %1866  ;;  %v1194_v17 = vsel %vm846_vm5, %v2227_v13, 0.0 }
 0x333   : > { %v2233_v5 = vpop.eup %1868  ;;  %1195 = vadd.xlane.f32.xlu0 %v1194_v17  ;;  %v1188_v4 = vsel %vm846_vm5, %v2229_v14, 0.0 }
 0x334   : > { %v1197_v3 = vsel %vm846_vm5, %v2233_v5, 0.0 }
 0x335   : > { %1198 = vadd.xlane.f32.xlu1 %v1197_v3 }
 0x337   : > { %1189 = vadd.xlane.f32.xlu0 %v1188_v4 }
 0x343   : > { %v900_v21 = vpop.xlane.xlu1 %899 }
 0x344   : > { %1870 = vrcp.f32 %v900_v21 }
 0x347   : > { %v903_v22 = vpop.xlane.xlu0 %902  ;;  %v906_v24 = vpop.xlane.xlu1 %905 }
 0x348   : > { %1872 = vrcp.f32 %v903_v22 }
 0x349   : > { %1874 = vrcp.f32 %v906_v24 }
 0x34b   : > { %v897_v25 = vpop.xlane.xlu0 %896  ;;  %v912_v28 = vpop.xlane.xlu1 %911 }
 0x34c   : > { %1876 = vrcp.f32 %v897_v25 }
 0x34d   : > { %1229 = vrot.lane.b32.xlu0 %v2193_v42, %s1914_s25  ;;  %1878 = vrcp.f32 %v912_v28  ;;  %s417_s25 = scalar_lea.vmem %s2346_s11, %s1665_s22 }
 0x34e   : > { %v1871_v32 = vpop.eup %1870 }
 0x34f   : > { %v915_v30 = vpop.xlane.xlu0 %914  ;;  %v928_v43 = vmul.f32 %v1871_v32, %v2158_v16 }
 0x350   : > { %1880 = vrcp.f32 %v915_v30  ;;  %v918_v31 = vpop.xlane.xlu1 %917 }
 0x351   : > { %1882 = vrcp.f32 %v918_v31  ;;  %v942_v53 = vmul.f32 %v2008_v7, %v928_v43 }
 0x352   : > { %v1873_v34 = vpop.eup %1872 }
 0x353   : > { %v1875_v35 = vpop.eup %1874  ;;  %v909_v38 = vpop.xlane.xlu0 %908  ;;  %v929_v40 = vmul.f32 %v1873_v34, %v2164_v19 }
 0x354   : > { %v930_v41 = vmul.f32 %v1875_v35, %v2162_v18  ;;  %1884 = vrcp.f32 %v909_v38 }
 0x355   : > { %v943_v42 = vmul.f32 %v2008_v7, %v929_v40 }
 0x356   : > { %v1877_v45 = vpop.eup %1876  ;;  %v944_v47 = vmul.f32 %v2008_v7, %v930_v41 }
 0x357   : > { %v927_v46 = vmul.f32 %v1877_v45, %v2170_v20  ;;  %v1879_v50 = vpop.eup %1878 }
 0x358   : > { %v950_v56 = vpack.c.bf16 %v944_v47, %v943_v42  ;;  %v932_v20 = vmul.f32 %v1879_v50, %v2172_v23 }
 0x359   : > { %v941_v52 = vmul.f32 %v2008_v7, %v927_v46 }
 0x35a   : > { %v1881_v54 = vpop.eup %1880  ;;  %v946_v33 = vmul.f32 %v2008_v7, %v932_v20 }
 0x35b   : > { %v1883_v55 = vpop.eup %1882  ;;  %v949_v19 = vpack.c.bf16 %v942_v53, %v941_v52  ;;  %v933_v18 = vmul.f32 %v1881_v54, %v2178_v26  ;;  %v1834_v52 = vld [vmem:[%s2344_s9] sm:$0xff]  }
 0x35c   : > { %v934_v16 = vmul.f32 %v1883_v55, %v2180_v27  ;;  %1772 = vmatprep.subr.bf16.mxu0 %v1834_v52 }
 0x35d   : > { %1744 = vmatprep.mubr.msk.bf16.mxu1 %vm846_vm5, %v949_v19  ;;  %v947_v59 = vmul.f32 %v2008_v7, %v933_v18  ;;  %1773 = vmatpush3.bf16.msra.mxu0 %v1834_v52 }
 0x35e   : > { %v1885_v57 = vpop.eup %1884  ;;  %1745 = vmatmul.mubr.msk.bf16.vlgmr.msra.gmra.mrb[12].mxu1 %vm846_vm5, %v950_v56  ;;  %v948_v60 = vmul.f32 %v2008_v7, %v934_v16 }
 0x35f   : > { %v931_v58 = vmul.f32 %v1885_v57, %v2184_v29 }
 0x360   : > { %v952_v37 = vpack.c.bf16 %v948_v60, %v947_v59 }
 0x361   : > { %v945_v61 = vmul.f32 %v2008_v7, %v931_v58 }
 0x363   : > { %v951_v26 = vpack.c.bf16 %v946_v33, %v945_v61 }
 0x365   : > { %1748 = vmatprep.mubr.msk.bf16.mxu1 %vm846_vm5, %v951_v26 }
 0x366   : > { %1749 = vmatmul.mubr.msk.bf16.gmra.mrb[16].mxu1 %vm846_vm5, %v952_v37 }
 0x3b6   : > { %v1181_v23 = vpop.xlane.xlu1 %1180 }
 0x3b7   : > { %1886 = vrcp.f32 %v1181_v23 }
 0x3b8   : > { %v1184_v27 = vpop.xlane.xlu0 %1183 }
 0x3b9   : > { %1888 = vrcp.f32 %v1184_v27 }
 0x3ba   : > { %v1187_v62 = vpop.xlane.xlu1 %1186 }
 0x3bb   : > { %1890 = vrcp.f32 %v1187_v62 }
 0x3bc   : > { %v1178_v29 = vpop.xlane.xlu0 %1177 }
 0x3bd   : > { %1892 = vrcp.f32 %v1178_v29 }
 0x3be   : > { %v1193_v63 = vpop.xlane.xlu1 %1192 }
 0x3bf   : > { %1894 = vrcp.f32 %v1193_v63 }
 0x3c0   : > { %v1196_v36 = vpop.xlane.xlu0 %1195 }
 0x3c1   : > { %1896 = vrcp.f32 %v1196_v36  ;;  %v1887_v1 = vpop.eup %1886 }
 0x3c2   : > { %v1199_v0 = vpop.xlane.xlu1 %1198  ;;  %v1209_v48 = vmul.f32 %v1887_v1, %v2207_v12 }
 0x3c3   : > { %1898 = vrcp.f32 %v1199_v0  ;;  %v1889_v2 = vpop.eup %1888 }
 0x3c4   : > { %v1190_v39 = vpop.xlane.xlu0 %1189  ;;  %v1210_v15 = vmul.f32 %v1889_v2, %v2211_v8  ;;  %v1217_v22 = vmul.f32 %v1209_v48, %v2008_v7 }
 0x3c5   : > { %v1891_v6 = vpop.eup %1890  ;;  %1900 = vrcp.f32 %v1190_v39 }
 0x3c6   : > { %v1211_v44 = vmul.f32 %v1891_v6, %v2217_v9  ;;  %v1218_v12 = vmul.f32 %v1210_v15, %v2008_v7 }
 0x3c7   : > { %v1893_v51 = vpop.eup %1892 }
 0x3c8   : > { %v1230_v11 = vpop.permute.xlu0 %1229  ;;  %v1208_v17 = vmul.f32 %v1893_v51, %v2213_v49  ;;  %v1219_v3 = vmul.f32 %v1211_v44, %v2008_v7 }
 0x3c9   : > { %v1244_v4 = vsel %vm572_vm1, %v1230_v11, 0  ;;  %1791 = vmatprep.subr.msk.bf16.mxu1 %vm572_vm1, %v1230_v11  ;;  %v1895_v9 = vpop.eup %1894 }
 0x3ca   : > { %1763 = vmatpush3.bf16.msra.mxu1 %v1244_v4  ;;  %v1216_v21 = vmul.f32 %v1208_v17, %v2008_v7  ;;  %v1225_v28 = vpack.c.bf16 %v1219_v3, %v1218_v12  ;;  %v1213_v49 = vmul.f32 %v1895_v9, %v2223_v10 }
 0x3cb   : > { %v1897_v24 = vpop.eup %1896 }
 0x3cc   : > { %v1224_v25 = vpack.c.bf16 %v1217_v22, %v1216_v21  ;;  %v1214_v32 = vmul.f32 %v1897_v24, %v2227_v13  ;;  %v1221_v40 = vmul.f32 %v1213_v49, %v2008_v7  ;;  %v1655_v22 = vld [vmem:[%s2345_s10] ss:$0 sm:$0xff] }
 0x3cd   : > { %v1899_v8 = vpop.eup %1898 }
 0x3ce   : > { %1764 = vmatprep.mubr.msk.bf16.mxu1 %vm846_vm5, %v1224_v25  ;;  %v1215_v30 = vmul.f32 %v1899_v8, %v2233_v5  ;;  %v1222_v41 = vmul.f32 %v1214_v32, %v2008_v7 }
 0x3cf   : > { %v1901_v31 = vpop.eup %1900  ;;  %1765 = vmatmul.mubr.msk.bf16.vlgmr.msra.gmra.mrb[20].mxu1 %vm846_vm5, %v1225_v28 }
 0x3d0   : > { %v1212_v34 = vmul.f32 %v1901_v31, %v2229_v14  ;;  %v1223_v35 = vmul.f32 %v1215_v30, %v2008_v7 }
 0x3d2   : > { %v1220_v38 = vmul.f32 %v1212_v34, %v2008_v7  ;;  %v1227_v45 = vpack.c.bf16 %v1223_v35, %v1222_v41  ;;  %v1835_v7 = vld [vmem:[%s2344_s9 + $0x8] sm:$0xff]  }
 0x3d3   : > { %1774 = vmatprep.subr.bf16.mxu0 %v1835_v7 }
 0x3d4   : > { %v1226_v43 = vpack.c.bf16 %v1221_v40, %v1220_v38  ;;  %1775 = vmatpush3.bf16.msra.mxu0 %v1835_v7 }
 0x3d6   : > { %1768 = vmatprep.mubr.msk.bf16.mxu1 %vm846_vm5, %v1226_v43 }
 0x3d7   : > { %1769 = vmatmul.mubr.msk.bf16.gmra.mrb[24].mxu1 %vm846_vm5, %v1227_v45 }
 0x431   : > { %v1746_v10 = vpop.f32.mrb[12].mxu1 }
 0x432   : > { %v1002_v5 = vpop.f32.mrb[13].mxu1 }
 0x433   : > { %v1747_v46 = vpop.f32.mrb[14].mxu1 }
 0x434   : > { %v1005_v13 = vpop.f32.mrb[15].mxu1 }
 0x439   : > { %v1750_v42 = vpop.f32.mrb[16].mxu1 }
 0x43a   : > { %v1018_v14 = vpop.f32.mrb[17].mxu1 }
 0x43b   : > { %v1751_v47 = vpop.f32.mrb[18].mxu1 }
 0x43c   : > { %v1021_v50 = vpop.f32.mrb[19].mxu1 }
 0x4a2   : > { %v1766_v53 = vpop.f32.mrb[20].mxu1 }
 0x4a3   : > { %v1280_v54 = vpop.f32.mrb[21].mxu1 }
 0x4a4   : > { %v1767_v55 = vpop.f32.mrb[22].mxu1 }
 0x4a5   : > { %v1809_v19 = vpack.i.bf16 %v1767_v55, %v1766_v53  ;;  %v1283_v56 = vpop.f32.mrb[23].mxu1 }
 0x4a6   : > { %v1804_v18 = vpack.i.bf16 %v1283_v56, %v1280_v54 }
 0x4a8   : > { %1805 = vrot.lane.b32.xlu1 %v1804_v18, %s1915_s19 }
 0x4aa   : > { %v1770_v16 = vpop.f32.mrb[24].mxu1 }
 0x4ab   : > { %v1296_v20 = vpop.f32.mrb[25].mxu1 }
 0x4ac   : > { %1810 = vrot.lane.b32.xlu1 %v1809_v19, %s1915_s19  ;;  %v1771_v57 = vpop.f32.mrb[26].mxu1 }
 0x4ad   : > { %v1819_v58 = vpack.i.bf16 %v1771_v57, %v1770_v16  ;;  %v1299_v59 = vpop.f32.mrb[27].mxu1 }
 0x4ae   : > { %v1814_v60 = vpack.i.bf16 %v1299_v59, %v1296_v20 }
 0x4b0   : > { %1820 = vrot.lane.b32.xlu1 %v1819_v58, %s1915_s19  ;;  %1815 = vrot.lane.b32.xlu0 %v1814_v60, %s1915_s19 }
 0x51a   : > { %v1806_v61 = vpop.permute.xlu1 %1805 }
 0x51b   : > { %v1808_v33 = vunpack.i.h.bf16 %v1806_v61  ;;  %v1807_v26 = vunpack.i.l.bf16 %v1806_v61 }
 0x51d   : > { %v1344_v37 = vsel %vm765_vm4, %v1005_v13, %v1808_v33  ;;  %v1343_v23 = vsel %vm765_vm4, %v1002_v5, %v1807_v26 }
 0x51e   : > { %v1351_v27 = vpack.c.bf16 %v1344_v37, %v1343_v23  ;;  %v1811_v62 = vpop.permute.xlu1 %1810 }
 0x51f   : > { %v1813_v29 = vunpack.i.h.bf16 %v1811_v62  ;;  %v1812_v63 = vunpack.i.l.bf16 %v1811_v62 }
 0x520   : > { %1776 = vmatprep.mubr.msk.bf16.mxu0 %vm470_vm0, %v1351_v27 }
 0x521   : > { %v1346_v36 = vsel %vm765_vm4, %v1747_v46, %v1813_v29  ;;  %v1345_v0 = vsel %vm765_vm4, %v1746_v10, %v1812_v63 }
 0x522   : > { %v1352_v1 = vpack.c.bf16 %v1346_v36, %v1345_v0  ;;  %v1816_v2 = vpop.permute.xlu0 %1815  ;;  %v1821_v39 = vpop.permute.xlu1 %1820 }
 0x523   : > { %v1818_v6 = vunpack.i.h.bf16 %v1816_v2  ;;  %v1817_v44 = vunpack.i.l.bf16 %v1816_v2  ;;  %v1823_v48 = vunpack.i.h.bf16 %v1821_v39  ;;  %v1822_v51 = vunpack.i.l.bf16 %v1821_v39 }
 0x524   : > { %1777 = vmatmul.mubr.msk.bf16.vlgmr.msra.gmra.mrb[20].mxu0 %vm470_vm0, %v1352_v1 }
 0x525   : > { %v1348_v15 = vsel %vm765_vm4, %v1021_v50, %v1818_v6  ;;  %v1347_v11 = vsel %vm765_vm4, %v1018_v14, %v1817_v44  ;;  %v1350_v17 = vsel %vm765_vm4, %v1751_v47, %v1823_v48  ;;  %v1349_v3 = vsel %vm765_vm4, %v1750_v42, %v1822_v51 }
 0x526   : > { %v1353_v4 = vpack.c.bf16 %v1348_v15, %v1347_v11  ;;  %v1354_v21 = vpack.c.bf16 %v1350_v17, %v1349_v3 }
 0x528   : > { %1780 = vmatprep.mubr.msk.bf16.mxu0 %vm470_vm0, %v1353_v4 }
 0x52c   : > { %1781 = vmatmul.mubr.msk.bf16.gmra.mrb[24].mxu0 %vm470_vm0, %v1354_v21 }
 0x5f7   : > { %v1778_v9 = vpop.f32.mrb[20].mxu0 }
 0x5f8   : > { %v1424_v12 = vpop.f32.mrb[21].mxu0  ;;  %v1433_v28 = vadd.f32 %v1778_v9, %v1655_v22 }
 0x5f9   : > { %v1425_v24 = vadd.f32 %v1655_v22, %v1424_v12  ;;  %v1779_v25 = vpop.f32.mrb[22].mxu0 }
 0x5fa   : > { %v1427_v8 = vpop.f32.mrb[23].mxu0  ;;  %v1436_v31 = vadd.f32 %v1779_v25, %v1655_v22  ;;  %v1458_v35 = vsel %vm470_vm0, %v1433_v28, 0.0 }
 0x5fb   : > { %v1428_v49 = vadd.f32 %v1655_v22, %v1427_v8  ;;  %v1455_v30 = vsel %vm470_vm0, %v1425_v24, 0.0 }
 0x5fc   : > { %v1460_v43 = vsel %vm470_vm0, %v1436_v31, 0.0 }
 0x5fd   : > { %v1456_v32 = vsel %vm470_vm0, %v1428_v49, 0.0 }
 0x5fe   : > { %v1457_v34 = vadd.f32 %v1456_v32, %v1455_v30 }
 0x5ff   : > { %v1782_v38 = vpop.f32.mrb[24].mxu0 }
 0x600   : > { %v1459_v40 = vadd.f32 %v1458_v35, %v1457_v34  ;;  %v1440_v41 = vpop.f32.mrb[25].mxu0  ;;  %v1449_v13 = vadd.f32 %v1782_v38, %v1655_v22 }
 0x601   : > { %v1441_v45 = vadd.f32 %v1655_v22, %v1440_v41  ;;  %v1783_v10 = vpop.f32.mrb[26].mxu0 }
 0x602   : > { %v1461_v5 = vadd.f32 %v1460_v43, %v1459_v40  ;;  %v1443_v46 = vpop.f32.mrb[27].mxu0  ;;  %v1452_v50 = vadd.f32 %v1783_v10, %v1655_v22  ;;  %v1466_v53 = vsel %vm470_vm0, %v1449_v13, 0.0 }
 0x603   : > { %v1462_v42 = vsel %vm470_vm0, %v1441_v45, 0.0  ;;  %v1444_v14 = vadd.f32 %v1655_v22, %v1443_v46 }
 0x604   : > { %v1463_v47 = vadd.f32 %v1462_v42, %v1461_v5  ;;  %v1468_v55 = vsel %vm470_vm0, %v1452_v50, 0.0 }
 0x605   : > { %v1464_v52 = vsel %vm470_vm0, %v1444_v14, 0.0 }
 0x606   : > { %v1465_v7 = vadd.f32 %v1464_v52, %v1463_v47 }
 0x608   : > { %v1467_v54 = vadd.f32 %v1466_v53, %v1465_v7 }
 0x60a   : > { %v1469_v19 = vadd.f32 %v1468_v55, %v1467_v54 }
 0x60c   : > { %v1470_v56 = vrot.slane %v1469_v19, 4 }
 0x60e   : > { %v1471_v18 = vadd.f32 %v1470_v56, %v1469_v19 }
 0x610   : > { %v1472_v16 = vrot.slane %v1471_v18, 2 }
 0x612   : > { %v1473_v20 = vadd.f32 %v1472_v16, %v1471_v18 }
 0x614   : > { %v1474_v57 = vrot.slane %v1473_v20, 1 }
 0x616   : > { %v1475_v58 = vadd.f32 %v1474_v57, %v1473_v20 }
 0x618   : > { %v1476_v59 = vmul.f32 0.015625, %v1475_v58 }
 0x61a   : > { %v1477_v60 = vsub.f32 %v1425_v24, %v1476_v59  ;;  %v1478_v61 = vsub.f32 %v1428_v49, %v1476_v59  ;;  %v1479_v33 = vsub.f32 %v1433_v28, %v1476_v59  ;;  %v1480_v26 = vsub.f32 %v1436_v31, %v1476_v59 }
 0x61b   : > { %v1481_v37 = vsub.f32 %v1441_v45, %v1476_v59  ;;  %v1482_v23 = vsub.f32 %v1444_v14, %v1476_v59  ;;  %v1483_v27 = vsub.f32 %v1449_v13, %v1476_v59  ;;  %v1484_v62 = vsub.f32 %v1452_v50, %v1476_v59 }
 0x61c   : > { %v1485_v29 = vmul.f32 %v1477_v60, %v1477_v60  ;;  %v1486_v63 = vmul.f32 %v1478_v61, %v1478_v61  ;;  %v1487_v36 = vmul.f32 %v1479_v33, %v1479_v33  ;;  %v1488_v0 = vmul.f32 %v1480_v26, %v1480_v26 }
 0x61d   : > { %v1489_v6 = vmul.f32 %v1481_v37, %v1481_v37  ;;  %v1490_v51 = vmul.f32 %v1482_v23, %v1482_v23  ;;  %v1491_v17 = vmul.f32 %v1483_v27, %v1483_v27  ;;  %v1492_v21 = vmul.f32 %v1484_v62, %v1484_v62 }
 0x61e   : > { %v1493_v1 = vsel %vm470_vm0, %v1485_v29, 0.0  ;;  %v1494_v2 = vsel %vm470_vm0, %v1486_v63, 0.0  ;;  %v1496_v44 = vsel %vm470_vm0, %v1487_v36, 0.0  ;;  %v1498_v15 = vsel %vm470_vm0, %v1488_v0, 0.0 }
 0x61f   : > { %v1495_v39 = vadd.f32 %v1494_v2, %v1493_v1  ;;  %v1500_v3 = vsel %vm470_vm0, %v1489_v6, 0.0  ;;  %v1502_v22 = vsel %vm470_vm0, %v1490_v51, 0.0  ;;  %v1504_v12 = vsel %vm470_vm0, %v1491_v17, 0.0 }
 0x620   : > { %v1506_v25 = vsel %vm470_vm0, %v1492_v21, 0.0 }
 0x621   : > { %v1497_v48 = vadd.f32 %v1496_v44, %v1495_v39 }
 0x623   : > { %v1499_v11 = vadd.f32 %v1498_v15, %v1497_v48 }
 0x625   : > { %v1501_v4 = vadd.f32 %v1500_v3, %v1499_v11 }
 0x627   : > { %v1503_v9 = vadd.f32 %v1502_v22, %v1501_v4 }
 0x629   : > { %v1505_v24 = vadd.f32 %v1504_v12, %v1503_v9 }
 0x62b   : > { %v1507_v8 = vadd.f32 %v1506_v25, %v1505_v24 }
 0x62d   : > { %v1508_v28 = vrot.slane %v1507_v8, 4 }
 0x62f   : > { %v1509_v49 = vadd.f32 %v1508_v28, %v1507_v8 }
 0x631   : > { %v1510_v30 = vrot.slane %v1509_v49, 2 }
 0x633   : > { %v1511_v31 = vadd.f32 %v1510_v30, %v1509_v49 }
 0x635   : > { %v1512_v32 = vrot.slane %v1511_v31, 1 }
 0x637   : > { %v1513_v34 = vadd.f32 %v1512_v32, %v1511_v31 }
 0x639   : > { %v1514_v35 = vmul.f32 0.015625, %v1513_v34 }
 0x63b   : > { %v1515_v38 = vadd.f32 1e-05, %v1514_v35 }
 0x63d   : > { %1902 = vrsqrt.f32 %v1515_v38 }
 0x647   : > { %v1903_v40 = vpop.eup %1902 }
 0x648   : > { %v1517_v41 = vmul.f32 %v1903_v40, %v1477_v60  ;;  %v1518_v43 = vmul.f32 %v1903_v40, %v1478_v61  ;;  %v1519_v45 = vmul.f32 %v1903_v40, %v1479_v33  ;;  %v1520_v10 = vmul.f32 %v1903_v40, %v1480_v26 }
 0x649   : > { %v1521_v5 = vmul.f32 %v1903_v40, %v1481_v37  ;;  %v1522_v46 = vmul.f32 %v1903_v40, %v1482_v23  ;;  %v1523_v13 = vmul.f32 %v1903_v40, %v1483_v27  ;;  %v1524_v42 = vmul.f32 %v1903_v40, %v1484_v62 }
 0x64a   : > { %1525 = vst.msk [vmem:[%s417_s25] sm:$0xff] %vm470_vm0, %v1517_v41  ;;  %1526 = vst.msk [vmem:[%s417_s25 + $0x8] sm:$0xff] %vm470_vm0, %v1518_v43 }
 0x64b   : > { %1527 = vst.msk [vmem:[%s417_s25 + $0x10] sm:$0xff] %vm470_vm0, %v1519_v45  ;;  %1528 = vst.msk [vmem:[%s417_s25 + $0x18] sm:$0xff] %vm470_vm0, %v1520_v10 }
 0x64c   : > { %1529 = vst.msk [vmem:[%s417_s25 + $0x20] sm:$0xff] %vm470_vm0, %v1521_v5  ;;  %1530 = vst.msk [vmem:[%s417_s25 + $0x28] sm:$0xff] %vm470_vm0, %v1522_v46 }
 0x64d   : > { %1531 = vst.msk [vmem:[%s417_s25 + $0x30] sm:$0xff] %vm470_vm0, %v1523_v13  ;;  %1532 = vst.msk [vmem:[%s417_s25 + $0x38] sm:$0xff] %vm470_vm0, %v1524_v42 }
 0x64e PF: > { %s21_s17 = sadd.s32 1, %s1910_s17  }
 0x64f   : > { %p18_p4 = scmp.ge.s32.totalorder %s21_s17, 4  }
 0x651   :  { %20 = sbr.rel (!%p18_p4) target bundleno = 1 (0x1), region = 100 }

</bundles_post_ra>
